<compile_context>
chip_gen: v7x
topology: tpu7x:2x2x1
jax: 0.10.0
libtpu: 0.0.40
codegen_flags: <defaults>
</compile_context>

<pallas_src>
import jax
import jax.numpy as jnp
from jax import lax
from jax.experimental import pallas as pl
from jax.experimental.pallas import tpu as pltpu

N_EMBD = 32
BLOCK_SIZE = 8            # max sequence length (tril buffer size in the reference)
N_HEAD = 4                # num_heads * head_size == n_embd, matching proj in-features
HEAD_SIZE = N_EMBD // 4   # reference uses n_embd // 4 = 8 as head_size
LN_EPS = 1e-5


def make_block_kernel(b_blk, T, C, n_head=N_HEAD, head_size=HEAD_SIZE):
    assert n_head * head_size == C, "kernel assumes n_head * head_size == n_embd"
    M = b_blk * T
    HT = n_head * T

    def kernel(x_ref, wqkv_ref, wp_ref, w1_ref, w2_ref, slab_ref, o_ref):
        # (B_blk, T, C) -> (M, C): leading-dim merge only (always-safe reshape).
        x = x_ref[...].reshape(M, C)

        # Packed constants slab (single DMA).
        # rows [0, HT)      : additive causal mask tiled over heads, lanes [0, T)
        # row  HT           : folded QKV bias   (b1 @ Wqkv), lanes [0, 3C)
        # row  HT + 1       : attention proj bias bp, lanes [0, C)
        # row  HT + 2       : folded FF bias  (b2 @ W1 + bb1), lanes [0, 4C)
        # row  HT + 3       : second FF bias bb2, lanes [0, C)
        slab = slab_ref[...]
        fmask_ht = slab[0:HT, 0:T]                     # (HT, T)
        bqkv = slab[HT + 0:HT + 1, 0:3 * C]            # (1, 3C)
        bp = slab[HT + 1:HT + 2, 0:C]                  # (1, C)
        bb1 = slab[HT + 2:HT + 3, 0:4 * C]             # (1, 4C)
        bb2 = slab[HT + 3:HT + 4, 0:C]                 # (1, C)

        # ---- LayerNorm 1 (affine folded into Wqkv / bqkv in the wrapper) ----
        mu = jnp.mean(x, axis=-1, keepdims=True)
        xc = x - mu
        var = jnp.mean(xc * xc, axis=-1, keepdims=True)
        xn = xc * lax.rsqrt(var + LN_EPS)

        # ---- fused QKV projection (C**-0.5 scale pre-folded into Q columns) ----
        qkv = jnp.dot(xn, wqkv_ref[...], preferred_element_type=jnp.float32) + bqkv
        qb = qkv[:, 0 * C:1 * C].reshape(b_blk, T, C)
        kb = qkv[:, 1 * C:2 * C].reshape(b_blk, T, C)
        vb = qkv[:, 2 * C:3 * C].reshape(b_blk, T, C)

        # ---- per-head scores (MXU), then ONE batched masked softmax ----
        weis = []
        for h in range(n_head):
            sl = slice(h * head_size, (h + 1) * head_size)
            weis.append(jnp.einsum('btd,bsd->bts', qb[..., sl], kb[..., sl],
                                   preferred_element_type=jnp.float32))  # (b, T, T)
        wei = jnp.concatenate(weis, axis=1)            # (b_blk, HT, T), sublane concat
        wei = wei + fmask_ht                           # additive causal mask (broadcast)
        wei = wei - jnp.max(wei, axis=-1, keepdims=True)
        e = jnp.exp(wei)
        s = jnp.sum(e, axis=-1, keepdims=True)
        p = e * pl.reciprocal(s, approx=False)         # exact: keeps 1e-4 tolerance

        # ---- per-head P @ V, lane-concat heads, single output projection ----
        outs = []
        for h in range(n_head):
            sl = slice(h * head_size, (h + 1) * head_size)
            ph = p[:, h * T:(h + 1) * T, :]            # (b_blk, T, T)
            outs.append(jnp.einsum('bts,bsd->btd', ph, vb[..., sl],
                                   preferred_element_type=jnp.float32))
        heads = jnp.concatenate(outs, axis=-1).reshape(M, C)   # (M, C), one vreg wide

        attn = jnp.dot(heads, wp_ref[...], preferred_element_type=jnp.float32) + bp
        x1 = x + attn                                  # residual 1

        # ---- LayerNorm 2 (affine folded into W1 / bb1) + FeedForward ----
        mu2 = jnp.mean(x1, axis=-1, keepdims=True)
        xc2 = x1 - mu2
        var2 = jnp.mean(xc2 * xc2, axis=-1, keepdims=True)
        x1n = xc2 * lax.rsqrt(var2 + LN_EPS)

        h1 = jnp.maximum(
            jnp.dot(x1n, w1_ref[...], preferred_element_type=jnp.float32) + bb1, 0.0)
        h2 = jnp.dot(h1, w2_ref[...], preferred_element_type=jnp.float32) + bb2

        out = (x1 + h2).astype(o_ref.dtype)            # residual 2
        o_ref[...] = out.reshape(b_blk, T, C)          # leading-dim split only

    return kernel


def block_forward(x, params, *, b_blk=None):
    """Pallas forward for the transformer Block.

    b_blk: batch rows per grid step.  Default = B (single grid step) -- optimal
    on single-TensorCore chips (v5e/v6e).  On v7x (2 TensorCores) pass
    b_blk = B // 2 for larger B so the "parallel" grid axis has work for both
    cores; at B=2 the single-step grid is still the right call.
    """
    B, T, C = x.shape
    (g1, b1, wq, wk, wv, wp, bp, g2, b2, w1, bb1, w2, bb2) = params
    f32 = jnp.float32
    n_head, head_size = N_HEAD, HEAD_SIZE
    HT = n_head * T

    # Fuse QKV; pre-fold the reference's C**-0.5 attention scale into Q columns.
    scale = f32(C) ** -0.5
    wqkv = jnp.concatenate([wq * scale, wk, wv], axis=1).astype(f32)       # (C, 3C)
    # Fold LN1 affine (g1, b1):  (xn*g1+b1)@Wqkv == xn@(g1.T*Wqkv) + b1@Wqkv
    bqkv = (b1.astype(f32) @ wqkv).reshape(-1)                              # (3C,)
    wqkv = g1.reshape(C, 1).astype(f32) * wqkv                              # (C, 3C)
    # Fold LN2 affine (g2, b2) into the first FF matmul / bias.
    bb1f = (b2.astype(f32) @ w1.astype(f32) + bb1.astype(f32)).reshape(-1)  # (4C,)
    w1f = g2.reshape(C, 1).astype(f32) * w1.astype(f32)                     # (C, 4C)

    # Pre-build the additive causal mask, tiled over heads (matches the
    # head-stacked score tensor layout in the kernel).
    causal = jnp.tril(jnp.ones((T, T), bool))
    fmask = jnp.where(causal, 0.0, -1e30).astype(f32)                       # (T, T)
    fmask_ht = jnp.tile(fmask, (n_head, 1))                                 # (HT, T)

    # Pack mask + all small bias vectors into ONE lane-padded slab (one DMA).
    slab_w = max(4 * C, 3 * C, 128)
    slab = jnp.zeros((HT + 4, slab_w), f32)
    slab = slab.at[0:HT, 0:T].set(fmask_ht)
    slab = slab.at[HT + 0, 0:3 * C].set(bqkv)
    slab = slab.at[HT + 1, 0:C].set(bp.reshape(-1).astype(f32))
    slab = slab.at[HT + 2, 0:4 * C].set(bb1f)
    slab = slab.at[HT + 3, 0:C].set(bb2.reshape(-1).astype(f32))

    if b_blk is None:
        b_blk = B                  # single-step grid: best on single-TC v5e/v6e
    assert B % b_blk == 0
    grid = (B // b_blk,)

    weights = (wqkv, wp.astype(f32), w1f, w2.astype(f32), slab)

    def wspec(arr):
        nd = arr.ndim
        return pl.BlockSpec(arr.shape, lambda i, _n=nd: (0,) * _n)

    kernel = make_block_kernel(b_blk, T, C, n_head=n_head, head_size=head_size)

    return pl.pallas_call(
        kernel,
        out_shape=jax.ShapeDtypeStruct((B, T, C), x.dtype),
        grid_spec=pltpu.PrefetchScalarGridSpec(
            num_scalar_prefetch=0,
            grid=grid,
            in_specs=[pl.BlockSpec((b_blk, T, C), lambda i: (i, 0, 0))]
                     + [wspec(w) for w in weights],
            out_specs=pl.BlockSpec((b_blk, T, C), lambda i: (i, 0, 0)),
        ),
        compiler_params=pltpu.CompilerParams(
            dimension_semantics=("parallel",)),   # batch axis: shardable on v7x
    )(x, *weights)


def block_reference(x, params):
    """Pure-JAX reference mirroring the PyTorch forward, for verification."""
    (g1, b1, wq, wk, wv, wp, bp, g2, b2, w1, bb1, w2, bb2) = params
    B, T, C = x.shape

    def ln(z, g, b):
        mu = jnp.mean(z, axis=-1, keepdims=True)
        var = jnp.mean((z - mu) ** 2, axis=-1, keepdims=True)
        return (z - mu) / jnp.sqrt(var + LN_EPS) * g[0] + b[0]

    xn = ln(x, g1, b1)
    q = xn @ wq
    k = xn @ wk
    v = xn @ wv
    mask = jnp.tril(jnp.ones((T, T), bool))
    outs = []
    for h in range(N_HEAD):
        sl = slice(h * HEAD_SIZE, (h + 1) * HEAD_SIZE)
        wei = jnp.einsum('btd,bsd->bts', q[..., sl], k[..., sl]) * (C ** -0.5)
        wei = jnp.where(mask, wei, -jnp.inf)
        wei = jax.nn.softmax(wei, axis=-1)
        outs.append(jnp.einsum('bts,bsd->btd', wei, v[..., sl]))
    attn = jnp.concatenate(outs, axis=-1) @ wp + bp[0]
    x1 = x + attn
    x1n = ln(x1, g2, b2)
    h1 = jnp.maximum(x1n @ w1 + bb1[0], 0.0)
    return x1 + (h1 @ w2 + bb2[0])


def init_params(key):
    ks = jax.random.split(key, 12)
    s = 0.1
    # Non-trivial LN affine params so the weight-folding algebra is exercised.
    g1 = 1.0 + 0.1 * jax.random.normal(ks[8], (1, N_EMBD), jnp.float32)
    b1 = 0.1 * jax.random.normal(ks[9], (1, N_EMBD), jnp.float32)
    g2 = 1.0 + 0.1 * jax.random.normal(ks[10], (1, N_EMBD), jnp.float32)
    b2 = 0.1 * jax.random.normal(ks[11], (1, N_EMBD), jnp.float32)
    wq = s * jax.random.normal(ks[0], (N_EMBD, N_HEAD * HEAD_SIZE), jnp.float32)
    wk = s * jax.random.normal(ks[1], (N_EMBD, N_HEAD * HEAD_SIZE), jnp.float32)
    wv = s * jax.random.normal(ks[2], (N_EMBD, N_HEAD * HEAD_SIZE), jnp.float32)
    wp = s * jax.random.normal(ks[3], (N_HEAD * HEAD_SIZE, N_EMBD), jnp.float32)
    bp = s * jax.random.normal(ks[4], (1, N_EMBD), jnp.float32)
    w1 = s * jax.random.normal(ks[5], (N_EMBD, 4 * N_EMBD), jnp.float32)
    bb1 = s * jax.random.normal(ks[6], (1, 4 * N_EMBD), jnp.float32)
    w2 = s * jax.random.normal(ks[7], (4 * N_EMBD, N_EMBD), jnp.float32)
    bb2 = jnp.zeros((1, N_EMBD), jnp.float32)
    return (g1, b1, wq, wk, wv, wp, bp, g2, b2, w1, bb1, w2, bb2)


if __name__ == "__main__":
    key = jax.random.PRNGKey(0)
    k_x, k_p = jax.random.split(key)

    B, T, C = 2, BLOCK_SIZE, N_EMBD              # (2, 8, 32)
    x = jax.random.normal(k_x, (B, T, C), jnp.float32)
    params = init_params(k_p)

    out = jax.block_until_ready(block_forward(x, params))

    ref = jax.block_until_ready(block_reference(x, params))
    assert out.shape == (B, T, C)
    err = float(jnp.max(jnp.abs(out - ref)))
    assert err < 1e-4, f"mismatch vs pure-JAX reference: max abs err = {err}"

    print("KERNEL_OK")
</pallas_src>

<mosaic_0001>
module attributes {stable_mosaic.version = 11 : i64} {
  func.func @kernel(%arg0: i32, %arg1: memref<2x8x32xf32, #tpu.memory_space<vmem>>, %arg2: memref<32x96xf32, #tpu.memory_space<vmem>>, %arg3: memref<32x32xf32, #tpu.memory_space<vmem>>, %arg4: memref<32x128xf32, #tpu.memory_space<vmem>>, %arg5: memref<128x32xf32, #tpu.memory_space<vmem>>, %arg6: memref<36x128xf32, #tpu.memory_space<vmem>>, %arg7: memref<2x8x32xf32, #tpu.memory_space<vmem>>) attributes {dimension_semantics = [#tpu.dimension_semantics<parallel>], iteration_bounds = array<i64: 1>, scalar_prefetch = 0 : i64, scratch_operands = 0 : i64, tpu.core_type = #tpu.core_type<tc>, window_params = [{transform_indices = @transform_0, window_bounds = array<i64: 2, 8, 32>}, {pipeline_mode = #tpu.pipeline_mode<synchronous>, transform_indices = @transform_1, window_bounds = array<i64: 32, 96>}, {pipeline_mode = #tpu.pipeline_mode<synchronous>, transform_indices = @transform_2, window_bounds = array<i64: 32, 32>}, {pipeline_mode = #tpu.pipeline_mode<synchronous>, transform_indices = @transform_3, window_bounds = array<i64: 32, 128>}, {pipeline_mode = #tpu.pipeline_mode<synchronous>, transform_indices = @transform_4, window_bounds = array<i64: 128, 32>}, {pipeline_mode = #tpu.pipeline_mode<synchronous>, transform_indices = @transform_5, window_bounds = array<i64: 36, 128>}, {transform_indices = @transform_6, window_bounds = array<i64: 2, 8, 32>}]} {
    %c0 = arith.constant 0 : index
    %c0_0 = arith.constant 0 : index
    %c0_1 = arith.constant 0 : index
    %0 = vector.load %arg1[%c0, %c0_0, %c0_1] : memref<2x8x32xf32, #tpu.memory_space<vmem>>, vector<2x8x32xf32>
    %1 = vector.shape_cast %0 : vector<2x8x32xf32> to vector<16x32xf32>
    %c0_2 = arith.constant 0 : index
    %c0_3 = arith.constant 0 : index
    %2 = vector.load %arg6[%c0_2, %c0_3] : memref<36x128xf32, #tpu.memory_space<vmem>>, vector<36x128xf32>
    %3 = vector.extract_strided_slice %2 {offsets = [0, 0], sizes = [32, 8], strides = [1, 1]} : vector<36x128xf32> to vector<32x8xf32>
    %4 = vector.extract_strided_slice %2 {offsets = [32, 0], sizes = [1, 96], strides = [1, 1]} : vector<36x128xf32> to vector<1x96xf32>
    %5 = vector.extract_strided_slice %2 {offsets = [33, 0], sizes = [1, 32], strides = [1, 1]} : vector<36x128xf32> to vector<1x32xf32>
    %6 = vector.extract_strided_slice %2 {offsets = [34, 0], sizes = [1, 128], strides = [1, 1]} : vector<36x128xf32> to vector<1x128xf32>
    %7 = vector.extract_strided_slice %2 {offsets = [35, 0], sizes = [1, 32], strides = [1, 1]} : vector<36x128xf32> to vector<1x32xf32>
    %cst = arith.constant dense<0.000000e+00> : vector<16xf32>
    %8 = vector.multi_reduction <add>, %1, %cst [1] : vector<16x32xf32> to vector<16xf32>
    %9 = vector.shape_cast %8 : vector<16xf32> to vector<16x1xf32>
    %cst_4 = arith.constant 3.200000e+01 : f32
    %10 = vector.broadcast %cst_4 : f32 to vector<16x1xf32>
    %11 = arith.divf %9, %10 : vector<16x1xf32>
    %12 = vector.broadcast %11 : vector<16x1xf32> to vector<16x32xf32>
    %13 = arith.subf %1, %12 : vector<16x32xf32>
    %14 = arith.mulf %13, %13 : vector<16x32xf32>
    %cst_5 = arith.constant dense<0.000000e+00> : vector<16xf32>
    %15 = vector.multi_reduction <add>, %14, %cst_5 [1] : vector<16x32xf32> to vector<16xf32>
    %16 = vector.shape_cast %15 : vector<16xf32> to vector<16x1xf32>
    %cst_6 = arith.constant 3.200000e+01 : f32
    %17 = vector.broadcast %cst_6 : f32 to vector<16x1xf32>
    %18 = arith.divf %16, %17 : vector<16x1xf32>
    %cst_7 = arith.constant 9.99999974E-6 : f32
    %19 = vector.broadcast %cst_7 : f32 to vector<16x1xf32>
    %20 = arith.addf %18, %19 : vector<16x1xf32>
    %21 = math.rsqrt %20 : vector<16x1xf32>
    %22 = vector.broadcast %21 : vector<16x1xf32> to vector<16x32xf32>
    %23 = arith.mulf %13, %22 : vector<16x32xf32>
    %c0_8 = arith.constant 0 : index
    %c0_9 = arith.constant 0 : index
    %24 = vector.load %arg2[%c0_8, %c0_9] : memref<32x96xf32, #tpu.memory_space<vmem>>, vector<32x96xf32>
    %cst_10 = arith.constant dense<0.000000e+00> : vector<16x96xf32>
    %25 = tpu.matmul %23, %24, %cst_10 {dimension_numbers = #tpu.dot_dimension_numbers<[1], [0], [0], [1], [0, 0, 1, 1], [], []>} : vector<16x32xf32>, vector<32x96xf32>, vector<16x96xf32> -> vector<16x96xf32>
    %26 = vector.broadcast %4 : vector<1x96xf32> to vector<16x96xf32>
    %27 = arith.addf %25, %26 : vector<16x96xf32>
    %28 = vector.extract_strided_slice %27 {offsets = [0, 0], sizes = [16, 32], strides = [1, 1]} : vector<16x96xf32> to vector<16x32xf32>
    %29 = vector.shape_cast %28 : vector<16x32xf32> to vector<2x8x32xf32>
    %30 = vector.extract_strided_slice %27 {offsets = [0, 32], sizes = [16, 32], strides = [1, 1]} : vector<16x96xf32> to vector<16x32xf32>
    %31 = vector.shape_cast %30 : vector<16x32xf32> to vector<2x8x32xf32>
    %32 = vector.extract_strided_slice %27 {offsets = [0, 64], sizes = [16, 32], strides = [1, 1]} : vector<16x96xf32> to vector<16x32xf32>
    %33 = vector.shape_cast %32 : vector<16x32xf32> to vector<2x8x32xf32>
    %34 = vector.extract_strided_slice %29 {offsets = [0, 0, 0], sizes = [2, 8, 8], strides = [1, 1, 1]} : vector<2x8x32xf32> to vector<2x8x8xf32>
    %35 = vector.extract_strided_slice %31 {offsets = [0, 0, 0], sizes = [2, 8, 8], strides = [1, 1, 1]} : vector<2x8x32xf32> to vector<2x8x8xf32>
    "tpu.trace_start"() <{level = 10 : i32, message = "btd,bsd->bts"}> : () -> ()
    %cst_11 = arith.constant dense<0.000000e+00> : vector<2x8x8xf32>
    %36 = tpu.matmul %34, %35, %cst_11 {dimension_numbers = #tpu.dot_dimension_numbers<[2], [2], [1], [1], [0, 0, 0, 1, 1, 1], [0], [0]>} : vector<2x8x8xf32>, vector<2x8x8xf32>, vector<2x8x8xf32> -> vector<2x8x8xf32>
    "tpu.trace_stop"() : () -> ()
    %37 = vector.extract_strided_slice %29 {offsets = [0, 0, 8], sizes = [2, 8, 8], strides = [1, 1, 1]} : vector<2x8x32xf32> to vector<2x8x8xf32>
    %38 = vector.extract_strided_slice %31 {offsets = [0, 0, 8], sizes = [2, 8, 8], strides = [1, 1, 1]} : vector<2x8x32xf32> to vector<2x8x8xf32>
    "tpu.trace_start"() <{level = 10 : i32, message = "btd,bsd->bts"}> : () -> ()
    %cst_12 = arith.constant dense<0.000000e+00> : vector<2x8x8xf32>
    %39 = tpu.matmul %37, %38, %cst_12 {dimension_numbers = #tpu.dot_dimension_numbers<[2], [2], [1], [1], [0, 0, 0, 1, 1, 1], [0], [0]>} : vector<2x8x8xf32>, vector<2x8x8xf32>, vector<2x8x8xf32> -> vector<2x8x8xf32>
    "tpu.trace_stop"() : () -> ()
    %40 = vector.extract_strided_slice %29 {offsets = [0, 0, 16], sizes = [2, 8, 8], strides = [1, 1, 1]} : vector<2x8x32xf32> to vector<2x8x8xf32>
    %41 = vector.extract_strided_slice %31 {offsets = [0, 0, 16], sizes = [2, 8, 8], strides = [1, 1, 1]} : vector<2x8x32xf32> to vector<2x8x8xf32>
    "tpu.trace_start"() <{level = 10 : i32, message = "btd,bsd->bts"}> : () -> ()
    %cst_13 = arith.constant dense<0.000000e+00> : vector<2x8x8xf32>
    %42 = tpu.matmul %40, %41, %cst_13 {dimension_numbers = #tpu.dot_dimension_numbers<[2], [2], [1], [1], [0, 0, 0, 1, 1, 1], [0], [0]>} : vector<2x8x8xf32>, vector<2x8x8xf32>, vector<2x8x8xf32> -> vector<2x8x8xf32>
    "tpu.trace_stop"() : () -> ()
    %43 = vector.extract_strided_slice %29 {offsets = [0, 0, 24], sizes = [2, 8, 8], strides = [1, 1, 1]} : vector<2x8x32xf32> to vector<2x8x8xf32>
    %44 = vector.extract_strided_slice %31 {offsets = [0, 0, 24], sizes = [2, 8, 8], strides = [1, 1, 1]} : vector<2x8x32xf32> to vector<2x8x8xf32>
    "tpu.trace_start"() <{level = 10 : i32, message = "btd,bsd->bts"}> : () -> ()
    %cst_14 = arith.constant dense<0.000000e+00> : vector<2x8x8xf32>
    %45 = tpu.matmul %43, %44, %cst_14 {dimension_numbers = #tpu.dot_dimension_numbers<[2], [2], [1], [1], [0, 0, 0, 1, 1, 1], [0], [0]>} : vector<2x8x8xf32>, vector<2x8x8xf32>, vector<2x8x8xf32> -> vector<2x8x8xf32>
    "tpu.trace_stop"() : () -> ()
    %46 = tpu.concatenate %36, %39, %42, %45 in 1 : vector<2x8x8xf32>, vector<2x8x8xf32>, vector<2x8x8xf32>, vector<2x8x8xf32> -> vector<2x32x8xf32>
    %47 = vector.shape_cast %3 : vector<32x8xf32> to vector<1x32x8xf32>
    %48 = vector.broadcast %47 : vector<1x32x8xf32> to vector<2x32x8xf32>
    %49 = arith.addf %46, %48 : vector<2x32x8xf32>
    %cst_15 = arith.constant dense<0xFF800000> : vector<2x32xf32>
    %50 = vector.multi_reduction <maximumf>, %49, %cst_15 [2] : vector<2x32x8xf32> to vector<2x32xf32>
    %51 = vector.shape_cast %50 : vector<2x32xf32> to vector<2x32x1xf32>
    %52 = vector.broadcast %51 : vector<2x32x1xf32> to vector<2x32x8xf32>
    %53 = arith.subf %49, %52 : vector<2x32x8xf32>
    %54 = math.exp %53 : vector<2x32x8xf32>
    %cst_16 = arith.constant dense<0.000000e+00> : vector<2x32xf32>
    %55 = vector.multi_reduction <add>, %54, %cst_16 [2] : vector<2x32x8xf32> to vector<2x32xf32>
    %56 = vector.shape_cast %55 : vector<2x32xf32> to vector<2x32x1xf32>
    %57 = tpu.reciprocal %56 : vector<2x32x1xf32> -> vector<2x32x1xf32>
    %58 = vector.broadcast %57 : vector<2x32x1xf32> to vector<2x32x8xf32>
    %59 = arith.mulf %54, %58 : vector<2x32x8xf32>
    %60 = vector.extract_strided_slice %59 {offsets = [0, 0, 0], sizes = [2, 8, 8], strides = [1, 1, 1]} : vector<2x32x8xf32> to vector<2x8x8xf32>
    %61 = vector.extract_strided_slice %33 {offsets = [0, 0, 0], sizes = [2, 8, 8], strides = [1, 1, 1]} : vector<2x8x32xf32> to vector<2x8x8xf32>
    "tpu.trace_start"() <{level = 10 : i32, message = "bts,bsd->btd"}> : () -> ()
    %cst_17 = arith.constant dense<0.000000e+00> : vector<2x8x8xf32>
    %62 = tpu.matmul %60, %61, %cst_17 {dimension_numbers = #tpu.dot_dimension_numbers<[2], [1], [1], [2], [0, 0, 0, 1, 1, 2], [0], [0]>} : vector<2x8x8xf32>, vector<2x8x8xf32>, vector<2x8x8xf32> -> vector<2x8x8xf32>
    "tpu.trace_stop"() : () -> ()
    %63 = vector.extract_strided_slice %59 {offsets = [0, 8, 0], sizes = [2, 8, 8], strides = [1, 1, 1]} : vector<2x32x8xf32> to vector<2x8x8xf32>
    %64 = vector.extract_strided_slice %33 {offsets = [0, 0, 8], sizes = [2, 8, 8], strides = [1, 1, 1]} : vector<2x8x32xf32> to vector<2x8x8xf32>
    "tpu.trace_start"() <{level = 10 : i32, message = "bts,bsd->btd"}> : () -> ()
    %cst_18 = arith.constant dense<0.000000e+00> : vector<2x8x8xf32>
    %65 = tpu.matmul %63, %64, %cst_18 {dimension_numbers = #tpu.dot_dimension_numbers<[2], [1], [1], [2], [0, 0, 0, 1, 1, 2], [0], [0]>} : vector<2x8x8xf32>, vector<2x8x8xf32>, vector<2x8x8xf32> -> vector<2x8x8xf32>
    "tpu.trace_stop"() : () -> ()
    %66 = vector.extract_strided_slice %59 {offsets = [0, 16, 0], sizes = [2, 8, 8], strides = [1, 1, 1]} : vector<2x32x8xf32> to vector<2x8x8xf32>
    %67 = vector.extract_strided_slice %33 {offsets = [0, 0, 16], sizes = [2, 8, 8], strides = [1, 1, 1]} : vector<2x8x32xf32> to vector<2x8x8xf32>
    "tpu.trace_start"() <{level = 10 : i32, message = "bts,bsd->btd"}> : () -> ()
    %cst_19 = arith.constant dense<0.000000e+00> : vector<2x8x8xf32>
    %68 = tpu.matmul %66, %67, %cst_19 {dimension_numbers = #tpu.dot_dimension_numbers<[2], [1], [1], [2], [0, 0, 0, 1, 1, 2], [0], [0]>} : vector<2x8x8xf32>, vector<2x8x8xf32>, vector<2x8x8xf32> -> vector<2x8x8xf32>
    "tpu.trace_stop"() : () -> ()
    %69 = vector.extract_strided_slice %59 {offsets = [0, 24, 0], sizes = [2, 8, 8], strides = [1, 1, 1]} : vector<2x32x8xf32> to vector<2x8x8xf32>
    %70 = vector.extract_strided_slice %33 {offsets = [0, 0, 24], sizes = [2, 8, 8], strides = [1, 1, 1]} : vector<2x8x32xf32> to vector<2x8x8xf32>
    "tpu.trace_start"() <{level = 10 : i32, message = "bts,bsd->btd"}> : () -> ()
    %cst_20 = arith.constant dense<0.000000e+00> : vector<2x8x8xf32>
    %71 = tpu.matmul %69, %70, %cst_20 {dimension_numbers = #tpu.dot_dimension_numbers<[2], [1], [1], [2], [0, 0, 0, 1, 1, 2], [0], [0]>} : vector<2x8x8xf32>, vector<2x8x8xf32>, vector<2x8x8xf32> -> vector<2x8x8xf32>
    "tpu.trace_stop"() : () -> ()
    %72 = tpu.concatenate %62, %65, %68, %71 in 2 : vector<2x8x8xf32>, vector<2x8x8xf32>, vector<2x8x8xf32>, vector<2x8x8xf32> -> vector<2x8x32xf32>
    %73 = vector.shape_cast %72 : vector<2x8x32xf32> to vector<16x32xf32>
    %c0_21 = arith.constant 0 : index
    %c0_22 = arith.constant 0 : index
    %74 = vector.load %arg3[%c0_21, %c0_22] : memref<32x32xf32, #tpu.memory_space<vmem>>, vector<32x32xf32>
    %cst_23 = arith.constant dense<0.000000e+00> : vector<16x32xf32>
    %75 = tpu.matmul %73, %74, %cst_23 {dimension_numbers = #tpu.dot_dimension_numbers<[1], [0], [0], [1], [0, 0, 1, 1], [], []>} : vector<16x32xf32>, vector<32x32xf32>, vector<16x32xf32> -> vector<16x32xf32>
    %76 = vector.broadcast %5 : vector<1x32xf32> to vector<16x32xf32>
    %77 = arith.addf %75, %76 : vector<16x32xf32>
    %78 = arith.addf %1, %77 : vector<16x32xf32>
    %cst_24 = arith.constant dense<0.000000e+00> : vector<16xf32>
    %79 = vector.multi_reduction <add>, %78, %cst_24 [1] : vector<16x32xf32> to vector<16xf32>
    %80 = vector.shape_cast %79 : vector<16xf32> to vector<16x1xf32>
    %cst_25 = arith.constant 3.200000e+01 : f32
    %81 = vector.broadcast %cst_25 : f32 to vector<16x1xf32>
    %82 = arith.divf %80, %81 : vector<16x1xf32>
    %83 = vector.broadcast %82 : vector<16x1xf32> to vector<16x32xf32>
    %84 = arith.subf %78, %83 : vector<16x32xf32>
    %85 = arith.mulf %84, %84 : vector<16x32xf32>
    %cst_26 = arith.constant dense<0.000000e+00> : vector<16xf32>
    %86 = vector.multi_reduction <add>, %85, %cst_26 [1] : vector<16x32xf32> to vector<16xf32>
    %87 = vector.shape_cast %86 : vector<16xf32> to vector<16x1xf32>
    %cst_27 = arith.constant 3.200000e+01 : f32
    %88 = vector.broadcast %cst_27 : f32 to vector<16x1xf32>
    %89 = arith.divf %87, %88 : vector<16x1xf32>
    %cst_28 = arith.constant 9.99999974E-6 : f32
    %90 = vector.broadcast %cst_28 : f32 to vector<16x1xf32>
    %91 = arith.addf %89, %90 : vector<16x1xf32>
    %92 = math.rsqrt %91 : vector<16x1xf32>
    %93 = vector.broadcast %92 : vector<16x1xf32> to vector<16x32xf32>
    %94 = arith.mulf %84, %93 : vector<16x32xf32>
    %c0_29 = arith.constant 0 : index
    %c0_30 = arith.constant 0 : index
    %95 = vector.load %arg4[%c0_29, %c0_30] : memref<32x128xf32, #tpu.memory_space<vmem>>, vector<32x128xf32>
    %cst_31 = arith.constant dense<0.000000e+00> : vector<16x128xf32>
    %96 = tpu.matmul %94, %95, %cst_31 {dimension_numbers = #tpu.dot_dimension_numbers<[1], [0], [0], [1], [0, 0, 1, 1], [], []>} : vector<16x32xf32>, vector<32x128xf32>, vector<16x128xf32> -> vector<16x128xf32>
    %97 = vector.broadcast %6 : vector<1x128xf32> to vector<16x128xf32>
    %98 = arith.addf %96, %97 : vector<16x128xf32>
    %cst_32 = arith.constant 0.000000e+00 : f32
    %99 = vector.broadcast %cst_32 : f32 to vector<16x128xf32>
    %100 = arith.maximumf %98, %99 : vector<16x128xf32>
    %c0_33 = arith.constant 0 : index
    %c0_34 = arith.constant 0 : index
    %101 = vector.load %arg5[%c0_33, %c0_34] : memref<128x32xf32, #tpu.memory_space<vmem>>, vector<128x32xf32>
    %cst_35 = arith.constant dense<0.000000e+00> : vector<16x32xf32>
    %102 = tpu.matmul %100, %101, %cst_35 {dimension_numbers = #tpu.dot_dimension_numbers<[1], [0], [0], [1], [0, 0, 1, 1], [], []>} : vector<16x128xf32>, vector<128x32xf32>, vector<16x32xf32> -> vector<16x32xf32>
    %103 = vector.broadcast %7 : vector<1x32xf32> to vector<16x32xf32>
    %104 = arith.addf %102, %103 : vector<16x32xf32>
    %105 = arith.addf %78, %104 : vector<16x32xf32>
    %106 = vector.shape_cast %105 : vector<16x32xf32> to vector<2x8x32xf32>
    %c0_36 = arith.constant 0 : index
    %c0_37 = arith.constant 0 : index
    %c0_38 = arith.constant 0 : index
    %107 = vector.load %arg7[%c0_36, %c0_37, %c0_38] : memref<2x8x32xf32, #tpu.memory_space<vmem>>, vector<2x8x32xf32>
    tpu.vector_store %arg7[%c0_36, %c0_37, %c0_38], %106 {strides = array<i32>} : memref<2x8x32xf32, #tpu.memory_space<vmem>>, vector<2x8x32xf32>,
    return
  }
  func.func @transform_0(%arg0: i32) -> (i32, i32, i32) {
    %c0_i32 = arith.constant 0 : i32
    %c0_i32_0 = arith.constant 0 : i32
    %c0_i32_1 = arith.constant 0 : i32
    return %arg0, %c0_i32, %c0_i32_0 : i32, i32, i32
  }
  func.func @transform_1(%arg0: i32) -> (i32, i32) {
    %c0_i32 = arith.constant 0 : i32
    %c0_i32_0 = arith.constant 0 : i32
    %c0_i32_1 = arith.constant 0 : i32
    return %c0_i32, %c0_i32_0 : i32, i32
  }
  func.func @transform_2(%arg0: i32) -> (i32, i32) {
    %c0_i32 = arith.constant 0 : i32
    %c0_i32_0 = arith.constant 0 : i32
    %c0_i32_1 = arith.constant 0 : i32
    return %c0_i32, %c0_i32_0 : i32, i32
  }
  func.func @transform_3(%arg0: i32) -> (i32, i32) {
    %c0_i32 = arith.constant 0 : i32
    %c0_i32_0 = arith.constant 0 : i32
    %c0_i32_1 = arith.constant 0 : i32
    return %c0_i32, %c0_i32_0 : i32, i32
  }
  func.func @transform_4(%arg0: i32) -> (i32, i32) {
    %c0_i32 = arith.constant 0 : i32
    %c0_i32_0 = arith.constant 0 : i32
    %c0_i32_1 = arith.constant 0 : i32
    return %c0_i32, %c0_i32_0 : i32, i32
  }
  func.func @transform_5(%arg0: i32) -> (i32, i32) {
    %c0_i32 = arith.constant 0 : i32
    %c0_i32_0 = arith.constant 0 : i32
    %c0_i32_1 = arith.constant 0 : i32
    return %c0_i32, %c0_i32_0 : i32, i32
  }
  func.func @transform_6(%arg0: i32) -> (i32, i32, i32) {
    %c0_i32 = arith.constant 0 : i32
    %c0_i32_0 = arith.constant 0 : i32
    %c0_i32_1 = arith.constant 0 : i32
    return %arg0, %c0_i32, %c0_i32_0 : i32, i32, i32
  }
}

</mosaic_0001>

<bundles_post_ra>
// kernel: tpu_custom_call.1
= control target key start
LH: loop header
LB: loop body
LE: loop exit
PB: predicated region body
PF: predicated region fallthrough
CT: control target
= control target key end

     0   :  { %vm31_vm0 = vcmask 261120   ;;  %s2574_s0 = inlined_call_operand.vmem [shape: f32[2,8,32], index: 0, kind: input, shape index: {}]   ;;  %s2575_s1 = inlined_call_operand.vmem [shape: f32[32,96], index: 1, kind: input, shape index: {}]   ;;  %s2576_s2 = inlined_call_operand.vmem [shape: f32[32,32], index: 2, kind: input, shape index: {}]   ;;  %s2577_s3 = inlined_call_operand.vmem [shape: f32[32,128], index: 3, kind: input, shape index: {}]   ;;  %s2578_s4 = inlined_call_operand.vmem [shape: f32[128,32], index: 4, kind: input, shape index: {}]   ;;  %s2579_s5 = inlined_call_operand.vmem [shape: f32[36,128], index: 5, kind: input, shape index: {}]   ;;  %s2580_s6 = inlined_call_operand.hbm [shape: f32[2,8,32], index: 6, kind: output, shape index: {}]  }
   0x1   :  { %v2270_v0 = vld [vmem:[%s2574_s0] sm:$0xff]  ;;  %v2275_v1 = vld [vmem:[%s2574_s0 + $0x8] sm:$0xff] }
   0x2   :  { %11 = vsyncpa [#allocation3], 0  ;;  %v32_v2 = vsel %vm31_vm0, %v2270_v0, 0.0  ;;  %v35_v3 = vsel %vm31_vm0, %v2275_v1, 0.0  ;;  %v59_v14 = vld [vmem:[%s2575_s1] sm:$0xff]  ;;  %v60_v15 = vld [vmem:[%s2575_s1 + $0x8] sm:$0xff]  ;;  %v63_v30 = vlaneseq }
   0x3   :  { %33 = vadd.xlane.f32.xlu0 %v32_v2  ;;  %v61_v16 = vld [vmem:[%s2575_s1 + $0x10] sm:$0xff]  ;;  %v2076_v17 = vpack.c.bf16 %v60_v15, %v59_v14  ;;  %v62_v18 = vld [vmem:[%s2575_s1 + $0x18] sm:$0xff]  ;;  %v2214_v32 = vmov 0.0   ;;  %vm2215_vm1 = vmmov 0   ;;  %v2311_v34 = vld [vmem:[%s2579_s5 + $0x20] sm:$0xf] }
   0x4   :  { %v2080_v19 = vpack.c.bf16 %v62_v18, %v61_v16  ;;  %v2299_v31 = vshrl.u32 %v63_v30, 7  ;;  %1949 = vmatprep.subr.mxu0 %v2214_v32  ;;  %1951 = vmatprep.mubr.msk.f32.mxu0 %vm2215_vm1, %v2214_v32  ;;  %s2216_s9 = smov 96   ;;  %s2217_s10 = smov 88   ;;  %vm151_vm2 = vcmask 64512   ;;  %v26_v54 = vld [vmem:[%s2579_s5] sm:$0xff]  ;;  %v29_v18 = vld [vmem:[%s2579_s5 + $0x18] sm:$0xff] }
   0x5   :  { %2077 = vmatprep.subr.bf16.mxu1 %v2076_v17  ;;  %s2218_s11 = smov 120   ;;  %s2219_s12 = smov 80   ;;  %vm1501_vm3 = vcmask 130048   ;;  %vm1504_vm4 = vcmask 195584  }
   0x6   :  { %2079 = vmatpush3.bf16.msra.mxu1 %v2076_v17  ;;  %v65_v33 = vsub.s32 0, %v2299_v31  ;;  %s2220_s13 = smov 112   ;;  %s2221_s14 = smov 72  }
   0x7   :  { %36 = vadd.xlane.f32.xlu0 %v35_v3  ;;  %2081 = vmatprep.subr.bf16.mxu1 %v2080_v19  ;;  %s2222_s15 = smov 104   ;;  %v28_v3 = vld [vmem:[%s2579_s5 + $0x10] sm:$0xff]  ;;  %s2223_s24 = smov 64  }
   0x8   :  { %v66_v35 = vrot.slane %v2311_v34, %v65_v33  ;;  %s2225_s0 = smov 48   ;;  %s2226_s25 = smov 40  }
   0xa   :  { %2083 = vmatpush3.bf16.msra.mxu1 %v2080_v19 }
   0xb   :  { %1939 = vmatprep.subr.mxu1 %v2214_v32 }
  0x90   :  { %v34_v4 = vpop.xlane.xlu0 %33 }
  0x91   :  { %v39_v5 = vmul.f32 0.03125, %v34_v4  ;;  %v27_v4 = vld [vmem:[%s2579_s5 + $0x8] sm:$0xff]  ;;  %s2224_s5 = smov 56  }
  0x93   :  { %v41_v6 = vsub.f32 %v2270_v0, %v39_v5 }
  0x94   :  { %v37_v7 = vpop.xlane.xlu0 %36 }
  0x95   :  { %v40_v8 = vmul.f32 0.03125, %v37_v7  ;;  %v43_v9 = vmul.f32 %v41_v6, %v41_v6 }
  0x97   :  { %v42_v10 = vsub.f32 %v2275_v1, %v40_v8  ;;  %v45_v11 = vsel %vm31_vm0, %v43_v9, 0.0 }
  0x98   :  { %46 = vadd.xlane.f32.xlu1 %v45_v11 }
  0x99   :  { %v44_v12 = vmul.f32 %v42_v10, %v42_v10 }
  0x9b   :  { %v48_v13 = vsel %vm31_vm0, %v44_v12, 0.0 }
  0x9c   :  { %49 = vadd.xlane.f32.xlu1 %v48_v13 }
 0x125   :  { %v47_v20 = vpop.xlane.xlu1 %46 }
 0x126   :  { %v51_v21 = vmul.f32 0.03125, %v47_v20 }
 0x128   :  { %v53_v22 = vadd.f32 1e-05, %v51_v21 }
 0x129   :  { %v50_v23 = vpop.xlane.xlu1 %49 }
 0x12a   :  { %2150 = vrsqrt.f32 %v53_v22  ;;  %v52_v24 = vmul.f32 0.03125, %v50_v23 }
 0x12c   :  { %v54_v25 = vadd.f32 1e-05, %v52_v24 }
 0x12e   :  { %2152 = vrsqrt.f32 %v54_v25 }
 0x134   :  { %v2151_v26 = vpop.eup %2150 }
 0x135   :  { %v57_v27 = vmul.f32 %v2151_v26, %v41_v6 }
 0x137   :  { %1936 = vmatprep.mubr.msk.f32.mxu1 %vm31_vm0, %v57_v27 }
 0x138   :  { %v2153_v28 = vpop.eup %2152 }
 0x139   :  { %v58_v29 = vmul.f32 %v2153_v28, %v42_v10 }
 0x13b   :  { %1937 = vmatmul.mubr.msk.f32.vlgmr.msra.gmra.mrb[0].mxu1 %vm31_vm0, %v58_v29 }
 0x13c   :  { %1941 = vmatprep.mubr.msk.f32.mxu1 %vm2215_vm1, %v2214_v32 }
 0x20e   :  { %v1938_v36 = vpop.f32.mrb[0].mxu1 }
 0x20f   :  { %v2314_v37 = vadd.f32 %v1938_v36, %v66_v35  ;;  %v139_v38 = vpop.f32.mrb[1].mxu1 }
 0x210   :  { %v2316_v39 = vadd.f32 %v139_v38, %v66_v35 }
 0x211   :  { %227 = vrot.lane.b32.xlu1 %v2314_v37, %s2216_s9 }
 0x212   :  { %149 = vrot.lane.b32.xlu0 %v2316_v39, %s2216_s9  ;;  %s2227_s9 = smov 8  }
 0x215   :  { %383 = vrot.lane.b32.xlu1 %v2314_v37, %s2217_s10 }
 0x216   :  { %303 = vrot.lane.b32.xlu0 %v2316_v39, %s2218_s11 }
 0x219   :  { %381 = vrot.lane.b32.xlu1 %v2314_v37, %s2218_s11 }
 0x21a   :  { %461 = vrot.lane.b32.xlu0 %v2316_v39, %s2219_s12 }
 0x21d   :  { %539 = vrot.lane.b32.xlu1 %v2314_v37, %s2219_s12 }
 0x21e   :  { %459 = vrot.lane.b32.xlu0 %v2316_v39, %s2220_s13 }
 0x221   :  { %305 = vrot.lane.b32.xlu1 %v2316_v39, %s2217_s10  ;;  %s2228_s10 = smov 16  }
 0x222   :  { %617 = vrot.lane.b32.xlu0 %v2316_v39, %s2221_s14 }
 0x225   :  { %537 = vrot.lane.b32.xlu1 %v2314_v37, %s2220_s13 }
 0x226   :  { %615 = vrot.lane.b32.xlu0 %v2316_v39, %s2222_s15 }
 0x229   :  { %695 = vrot.lane.b32.xlu1 %v2314_v37, %s2221_s14 }
 0x22d   :  { %693 = vrot.lane.b32.xlu1 %v2314_v37, %s2222_s15 }
 0x283   :  { %v228_v40 = vpop.permute.xlu1 %227 }
 0x284   :  { %v150_v41 = vpop.permute.xlu0 %149 }
 0x285   :  { %1940 = vmatpush3.xpose.msk.msra.mxu1 %vm151_vm2, %v150_v41 }
 0x286   :  { %1944 = vmatprep.subr.mxu1 %v2214_v32 }
 0x287   :  { %v384_v42 = vpop.permute.xlu1 %383 }
 0x288   :  { %1942 = vmatmul.mubr.msk.f32.vlgmr.msra.gmra.mrb[2].mxu1 %vm151_vm2, %v2316_v39  ;;  %v304_v43 = vpop.permute.xlu0 %303 }
 0x289   :  { %1945 = vmatpush3.xpose.msk.msra.mxu1 %vm151_vm2, %v228_v40  ;;  %1946 = vmatprep.mubr.msk.f32.mxu1 %vm2215_vm1, %v2214_v32 }
 0x28a   :  { %1954 = vmatprep.subr.mxu1 %v2214_v32 }
 0x28b   :  { %v382_v44 = vpop.permute.xlu1 %381 }
 0x28c   :  { %1947 = vmatmul.mubr.msk.f32.vlgmr.msra.gmra.mrb[4].mxu1 %vm151_vm2, %v2314_v37  ;;  %v462_v45 = vpop.permute.xlu0 %461 }
 0x28d   :  { %1955 = vmatpush3.xpose.msk.msra.mxu1 %vm151_vm2, %v384_v42  ;;  %1956 = vmatprep.mubr.msk.f32.mxu1 %vm2215_vm1, %v2214_v32 }
 0x28e   :  { %1964 = vmatprep.subr.mxu1 %v2214_v32 }
 0x28f   :  { %v540_v46 = vpop.permute.xlu1 %539 }
 0x290   :  { %1957 = vmatmul.mubr.msk.f32.vlgmr.msra.gmra.mrb[6].mxu1 %vm151_vm2, %v382_v44  ;;  %v460_v47 = vpop.permute.xlu0 %459 }
 0x291   :  { %1965 = vmatpush3.xpose.msk.msra.mxu1 %vm151_vm2, %v540_v46  ;;  %1966 = vmatprep.mubr.msk.f32.mxu1 %vm2215_vm1, %v2214_v32 }
 0x292   :  { %1974 = vmatprep.subr.mxu1 %v2214_v32 }
 0x293   :  { %v306_v48 = vpop.permute.xlu1 %305 }
 0x294   :  { %1950 = vmatpush3.xpose.msk.msra.mxu0 %vm151_vm2, %v306_v48  ;;  %v618_v50 = vpop.permute.xlu0 %617 }
 0x295   :  { %1959 = vmatprep.subr.mxu0 %v2214_v32 }
 0x297   :  { %v538_v49 = vpop.permute.xlu1 %537  ;;  %1952 = vmatmul.mubr.msk.f32.vlgmr.msra.gmra.mrb[0].mxu0 %vm151_vm2, %v304_v43 }
 0x298   :  { %1960 = vmatpush3.xpose.msk.msra.mxu0 %vm151_vm2, %v462_v45  ;;  %1967 = vmatmul.mubr.msk.f32.vlgmr.msra.gmra.mrb[8].mxu1 %vm151_vm2, %v538_v49  ;;  %v616_v52 = vpop.permute.xlu0 %615 }
 0x299   :  { %1961 = vmatprep.mubr.msk.f32.mxu0 %vm2215_vm1, %v2214_v32  ;;  %1969 = vmatprep.subr.mxu0 %v2214_v32 }
 0x29a   :  { %1976 = vmatprep.mubr.msk.f32.mxu1 %vm2215_vm1, %v2214_v32 }
 0x29b   :  { %v696_v51 = vpop.permute.xlu1 %695  ;;  %1962 = vmatmul.mubr.msk.f32.vlgmr.msra.gmra.mrb[2].mxu0 %vm151_vm2, %v460_v47 }
 0x29c   :  { %1970 = vmatpush3.xpose.msk.msra.mxu0 %vm151_vm2, %v618_v50  ;;  %1975 = vmatpush3.xpose.msk.msra.mxu1 %vm151_vm2, %v696_v51 }
 0x29d   :  { %1971 = vmatprep.mubr.msk.f32.mxu0 %vm2215_vm1, %v2214_v32  ;;  %1984 = vmatprep.subr.mxu1 %v2214_v32 }
 0x29e   :  { %1979 = vmatprep.subr.mxu0 %v2214_v32 }
 0x29f   :  { %v694_v53 = vpop.permute.xlu1 %693  ;;  %1972 = vmatmul.mubr.msk.f32.vlgmr.msra.gmra.mrb[4].mxu0 %vm151_vm2, %v616_v52 }
 0x2a0   :  { %1977 = vmatmul.mubr.msk.f32.vlgmr.msra.gmra.mrb[10].mxu1 %vm151_vm2, %v694_v53  ;;  %1981 = vmatprep.mubr.msk.f32.mxu0 %vm2215_vm1, %v2214_v32 }
 0x2a1   :  { %1986 = vmatprep.mubr.msk.f32.mxu1 %vm2215_vm1, %v2214_v32 }
 0x35b   :  { %v222_v55 = vpop.f32.mrb[2].mxu1 }
 0x35c   :  { %v771_v56 = vadd.f32 %v222_v55, %v26_v54  ;;  %v1943_v57 = vpop.f32.mrb[3].mxu1 }
 0x35e   :  { %v779_v58 = vsel %vm151_vm2, %v771_v56, -inf }
 0x35f   :  { %780 = vmax.xlane.f32.xlu0 %v779_v58  ;;  %v299_v59 = vpop.f32.mrb[4].mxu1 }
 0x360   :  { %v775_v60 = vadd.f32 %v299_v59, %v26_v54  ;;  %v1948_v61 = vpop.f32.mrb[5].mxu1 }
 0x362   :  { %v791_v62 = vsel %vm151_vm2, %v775_v60, -inf }
 0x363   :  { %792 = vmax.xlane.f32.xlu1 %v791_v62  ;;  %v455_v63 = vpop.f32.mrb[6].mxu1 }
 0x364   :  { %v1958_v2 = vpop.f32.mrb[7].mxu1  ;;  %v776_v11 = vadd.f32 %v455_v63, %v27_v4 }
 0x366   :  { %v794_v17 = vsel %vm151_vm2, %v776_v11, -inf }
 0x36a   :  { %v377_v5 = vpop.f32.mrb[0].mxu0 }
 0x36b   :  { %v772_v6 = vadd.f32 %v377_v5, %v27_v4  ;;  %v1953_v7 = vpop.f32.mrb[1].mxu0  ;;  %v611_v8 = vpop.f32.mrb[8].mxu1 }
 0x36c   :  { %v777_v9 = vadd.f32 %v611_v8, %v28_v3  ;;  %v1968_v10 = vpop.f32.mrb[9].mxu1 }
 0x36d   :  { %v782_v12 = vsel %vm151_vm2, %v772_v6, -inf }
 0x36e   :  { %783 = vmax.xlane.f32.xlu0 %v782_v12  ;;  %v533_v13 = vpop.f32.mrb[2].mxu0  ;;  %v797_v14 = vsel %vm151_vm2, %v777_v9, -inf }
 0x36f   :  { %798 = vmax.xlane.f32.xlu1 %v797_v14  ;;  %v1963_v15 = vpop.f32.mrb[3].mxu0  ;;  %v773_v16 = vadd.f32 %v533_v13, %v28_v3 }
 0x371   :  { %v785_v25 = vsel %vm151_vm2, %v773_v16, -inf }
 0x372   :  { %795 = vmax.xlane.f32.xlu0 %v794_v17  ;;  %v689_v19 = vpop.f32.mrb[4].mxu0 }
 0x373   :  { %v1973_v20 = vpop.f32.mrb[5].mxu0  ;;  %v767_v21 = vpop.f32.mrb[10].mxu1  ;;  %v774_v24 = vadd.f32 %v689_v19, %v29_v18 }
 0x374   :  { %v778_v22 = vadd.f32 %v767_v21, %v29_v18  ;;  %v1978_v23 = vpop.f32.mrb[11].mxu1 }
 0x375   :  { %v788_v27 = vsel %vm151_vm2, %v774_v24, -inf }
 0x376   :  { %786 = vmax.xlane.f32.xlu0 %v785_v25  ;;  %v800_v26 = vsel %vm151_vm2, %v778_v22, -inf }
 0x377   :  { %801 = vmax.xlane.f32.xlu1 %v800_v26 }
 0x37a   :  { %789 = vmax.xlane.f32.xlu0 %v788_v27 }
 0x388   :  { %943 = vrot.lane.b32.xlu1 %v2314_v37, %s2223_s24 }
 0x38c   :  { %1019 = vrot.lane.b32.xlu1 %v2316_v39, %s2224_s5 }
 0x390   :  { %1095 = vrot.lane.b32.xlu1 %v2314_v37, %s2224_s5  ;;  %867 = vrot.lane.b32.xlu0 %v2316_v39, %s2223_s24 }
 0x394   :  { %1247 = vrot.lane.b32.xlu1 %v2314_v37, %s2225_s0  ;;  %1171 = vrot.lane.b32.xlu0 %v2316_v39, %s2225_s0 }
 0x3ec   :  { %v781_v28 = vpop.xlane.xlu0 %780 }
 0x3ed   :  { %v803_v29 = vsub.f32 %v771_v56, %v781_v28 }
 0x3ef   :  { %v811_v30 = vmul.f32 1.442695, %v803_v29 }
 0x3f0   :  { %v793_v33 = vpop.xlane.xlu1 %792 }
 0x3f1   :  { %2154 = vpow2.f32 %v811_v30  ;;  %v807_v35 = vsub.f32 %v775_v60, %v793_v33 }
 0x3f3   :  { %v819_v36 = vmul.f32 1.442695, %v807_v35 }
 0x3f5   :  { %2156 = vpow2.f32 %v819_v36 }
 0x3fb   :  { %v2400_v38 = vpop.eup %2154  ;;  %v784_v40 = vpop.xlane.xlu0 %783 }
 0x3fc   :  { %v804_v41 = vsub.f32 %v772_v6, %v784_v40  ;;  %v799_v42 = vpop.xlane.xlu1 %798  ;;  %v827_v43 = vsel %vm151_vm2, %v2400_v38, 0.0 }
 0x3fd   :  { %828 = vadd.xlane.f32.xlu0 %v827_v43  ;;  %v809_v45 = vsub.f32 %v777_v9, %v799_v42 }
 0x3fe   :  { %v813_v44 = vmul.f32 1.442695, %v804_v41 }
 0x3ff   :  { %v2404_v46 = vpop.eup %2156  ;;  %v796_v47 = vpop.xlane.xlu0 %795  ;;  %v823_v50 = vmul.f32 1.442695, %v809_v45 }
 0x400   :  { %2158 = vpow2.f32 %v813_v44  ;;  %v808_v48 = vsub.f32 %v776_v11, %v796_v47  ;;  %v839_v49 = vsel %vm151_vm2, %v2404_v46, 0.0 }
 0x401   :  { %840 = vadd.xlane.f32.xlu1 %v839_v49 }
 0x402   :  { %v821_v51 = vmul.f32 1.442695, %v808_v48 }
 0x403   :  { %v787_v52 = vpop.xlane.xlu0 %786 }
 0x404   :  { %2160 = vpow2.f32 %v821_v51  ;;  %v805_v53 = vsub.f32 %v773_v16, %v787_v52  ;;  %v802_v54 = vpop.xlane.xlu1 %801  ;;  %v1508_v51 = vld [vmem:[%s2576_s2 + $0x8] sm:$0xff] }
 0x405   :  { %v810_v55 = vsub.f32 %v778_v22, %v802_v54  ;;  %2162 = vpow2.f32 %v823_v50  ;;  %v1507_v50 = vld [vmem:[%s2576_s2] sm:$0xff] }
 0x406   :  { %v815_v56 = vmul.f32 1.442695, %v805_v53  ;;  %v2084_v52 = vpack.c.bf16 %v1508_v51, %v1507_v50  ;;  %v1510_v53 = vld [vmem:[%s2576_s2 + $0x18] sm:$0xff]  ;;  %v1719_v50 = vld [vmem:[%s2578_s4 + $0x20] sm:$0xff]  ;;  %v1720_v51 = vld [vmem:[%s2578_s4 + $0x28] sm:$0xff] }
 0x407   :  { %v825_v57 = vmul.f32 1.442695, %v810_v55  ;;  %v790_v58 = vpop.xlane.xlu0 %789 }
 0x408   :  { %2164 = vpow2.f32 %v815_v56  ;;  %v806_v59 = vsub.f32 %v774_v24, %v790_v58  ;;  %v944_v60 = vpop.permute.xlu1 %943 }
 0x409   :  { %1985 = vmatpush3.msra.mxu1 %v944_v60  ;;  %2166 = vpow2.f32 %v825_v57 }
 0x40a   :  { %v2159_v61 = vpop.eup %2158  ;;  %v817_v62 = vmul.f32 1.442695, %v806_v59  ;;  %1994 = vmatprep.subr.mxu1 %v2214_v32 }
 0x40b   :  { %v868_v63 = vpop.permute.xlu0 %867  ;;  %v830_v2 = vsel %vm151_vm2, %v2159_v61, 0.0 }
 0x40c   :  { %2168 = vpow2.f32 %v817_v62  ;;  %831 = vadd.xlane.f32.xlu0 %v830_v2  ;;  %1980 = vmatpush3.msra.mxu0 %v868_v63  ;;  %v1020_v13 = vpop.permute.xlu1 %1019 }
 0x40d   :  { %1989 = vmatprep.subr.mxu0 %v2214_v32 }
 0x40e   :  { %v2161_v3 = vpop.eup %2160 }
 0x40f   :  { %v842_v4 = vsel %vm151_vm2, %v2161_v3, 0.0  ;;  %v2163_v5 = vpop.eup %2162  ;;  %v1172_v15 = vpop.permute.xlu0 %1171 }
 0x410   :  { %843 = vadd.xlane.f32.xlu1 %v842_v4  ;;  %v845_v7 = vsel %vm151_vm2, %v2163_v5, 0.0  ;;  %v1096_v14 = vpop.permute.xlu1 %1095 }
 0x412   :  { %v2165_v6 = vpop.eup %2164 }
 0x413   :  { %v833_v8 = vsel %vm151_vm2, %v2165_v6, 0.0  ;;  %v2414_v9 = vpop.eup %2166 }
 0x414   :  { %846 = vadd.xlane.f32.xlu1 %v845_v7  ;;  %834 = vadd.xlane.f32.xlu0 %v833_v8  ;;  %v848_v11 = vsel %vm151_vm2, %v2414_v9, 0.0  ;;  %v1248_v16 = vpop.permute.xlu1 %1247 }
 0x416   :  { %v2416_v10 = vpop.eup %2168 }
 0x417   :  { %v836_v12 = vsel %vm151_vm2, %v2416_v10, 0.0 }
 0x418   :  { %849 = vadd.xlane.f32.xlu1 %v848_v11  ;;  %837 = vadd.xlane.f32.xlu0 %v836_v12 }
 0x429   :  { %1399 = vrot.lane.b32.xlu1 %v2314_v37, %s2226_s25 }
 0x42e   :  { %1323 = vrot.lane.b32.xlu0 %v2316_v39, %s2226_s25 }
 0x48a   :  { %v829_v17 = vpop.xlane.xlu0 %828 }
 0x48b   :  { %2170 = vrcp.f32 %v829_v17  ;;  %v1513_v17 = vsub.s32 1, %v2299_v31 }
 0x48e   :  { %v841_v18 = vpop.xlane.xlu1 %840 }
 0x48f   :  { %2172 = vrcp.f32 %v841_v18  ;;  %v1514_v18 = vrot.slane %v2311_v34, %v1513_v17 }
 0x495   :  { %v2171_v19 = vpop.eup %2170 }
 0x496   :  { %v859_v20 = vmul.f32 %v2171_v19, %v2400_v38 }
 0x498   :  { %1982 = vmatmul.mubr.msk.f32.vlgmr.msra.gmra.mrb[6].mxu0 %vm151_vm2, %v859_v20 }
 0x499   :  { %v2173_v21 = vpop.eup %2172  ;;  %1990 = vmatpush3.msra.mxu0 %v1020_v13  ;;  %v832_v22 = vpop.xlane.xlu0 %831  ;;  %1991 = vmatprep.mubr.msk.f32.mxu0 %vm2215_vm1, %v2214_v32 }
 0x49a   :  { %v863_v37 = vmul.f32 %v2173_v21, %v2404_v46  ;;  %2174 = vrcp.f32 %v832_v22  ;;  %1999 = vmatprep.subr.mxu0 %v2214_v32 }
 0x49c   :  { %1987 = vmatmul.mubr.msk.f32.vlgmr.msra.gmra.mrb[12].mxu1 %vm151_vm2, %v863_v37 }
 0x49d   :  { %1995 = vmatpush3.msra.mxu1 %v1096_v14  ;;  %v844_v39 = vpop.xlane.xlu1 %843  ;;  %1996 = vmatprep.mubr.msk.f32.mxu1 %vm2215_vm1, %v2214_v32 }
 0x49e   :  { %2176 = vrcp.f32 %v844_v39  ;;  %2004 = vmatprep.subr.mxu1 %v2214_v32 }
 0x4a1   :  { %v847_v23 = vpop.xlane.xlu1 %846  ;;  %v835_v24 = vpop.xlane.xlu0 %834 }
 0x4a2   :  { %2178 = vrcp.f32 %v847_v23 }
 0x4a3   :  { %2180 = vrcp.f32 %v835_v24 }
 0x4a4   :  { %v2175_v25 = vpop.eup %2174 }
 0x4a5   :  { %v860_v26 = vmul.f32 %v2175_v25, %v2159_v61  ;;  %v850_v27 = vpop.xlane.xlu1 %849  ;;  %v838_v28 = vpop.xlane.xlu0 %837 }
 0x4a6   :  { %2182 = vrcp.f32 %v850_v27 }
 0x4a7   :  { %2184 = vrcp.f32 %v838_v28  ;;  %1992 = vmatmul.mubr.msk.f32.vlgmr.msra.gmra.mrb[8].mxu0 %vm151_vm2, %v860_v26 }
 0x4a8   :  { %v2177_v29 = vpop.eup %2176  ;;  %2000 = vmatpush3.msra.mxu0 %v1172_v15  ;;  %2001 = vmatprep.mubr.msk.f32.mxu0 %vm2215_vm1, %v2214_v32 }
 0x4a9   :  { %v864_v30 = vmul.f32 %v2177_v29, %v2161_v3  ;;  %2009 = vmatprep.subr.mxu0 %v2214_v32  ;;  %v1400_v40 = vpop.permute.xlu1 %1399  ;;  %v1324_v42 = vpop.permute.xlu0 %1323 }
 0x4ab   :  { %1997 = vmatmul.mubr.msk.f32.vlgmr.msra.gmra.mrb[14].mxu1 %vm151_vm2, %v864_v30 }
 0x4ac   :  { %v2179_v33 = vpop.eup %2178  ;;  %2005 = vmatpush3.msra.mxu1 %v1248_v16  ;;  %2006 = vmatprep.mubr.msk.f32.mxu1 %vm2215_vm1, %v2214_v32 }
 0x4ad   :  { %v2181_v35 = vpop.eup %2180  ;;  %v865_v36 = vmul.f32 %v2179_v33, %v2163_v5  ;;  %2014 = vmatprep.subr.mxu1 %v2214_v32 }
 0x4ae   :  { %v861_v38 = vmul.f32 %v2181_v35, %v2165_v6 }
 0x4af   :  { %2007 = vmatmul.mubr.msk.f32.vlgmr.msra.gmra.mrb[16].mxu1 %vm151_vm2, %v865_v36  ;;  %v1624_v36 = vld [vmem:[%s2577_s3] sm:$0xff] }
 0x4b0   :  { %v2183_v41 = vpop.eup %2182  ;;  %2002 = vmatmul.mubr.msk.f32.vlgmr.msra.gmra.mrb[10].mxu0 %vm151_vm2, %v861_v38  ;;  %2015 = vmatpush3.msra.mxu1 %v1400_v40  ;;  %v1625_v38 = vld [vmem:[%s2577_s3 + $0x8] sm:$0xff] }
 0x4b1   :  { %v2185_v43 = vpop.eup %2184  ;;  %v866_v44 = vmul.f32 %v2183_v41, %v2414_v9  ;;  %2010 = vmatpush3.msra.mxu0 %v1324_v42  ;;  %2011 = vmatprep.mubr.msk.f32.mxu0 %vm2215_vm1, %v2214_v32  ;;  %v2092_v40 = vpack.c.bf16 %v1625_v38, %v1624_v36  ;;  %v1626_v41 = vld [vmem:[%s2577_s3 + $0x10] sm:$0xff]  ;;  %v1627_v42 = vld [vmem:[%s2577_s3 + $0x18] sm:$0xff] }
 0x4b2   :  { %v862_v45 = vmul.f32 %v2185_v43, %v2416_v10  ;;  %2016 = vmatprep.mubr.msk.f32.mxu1 %vm2215_vm1, %v2214_v32  ;;  %2085 = vmatprep.subr.bf16.mxu1 %v2084_v52  ;;  %v1509_v32 = vld [vmem:[%s2576_s2 + $0x10] sm:$0xff]  ;;  %s2229_s2 = smov 24   ;;  %v2096_v43 = vpack.c.bf16 %v1627_v42, %v1626_v41 }
 0x4b3   :  { %2017 = vmatmul.mubr.msk.f32.vlgmr.msra.gmra.mrb[18].mxu1 %vm151_vm2, %v866_v44  ;;  %v2088_v54 = vpack.c.bf16 %v1510_v53, %v1509_v32  ;;  %v1715_v44 = vld [vmem:[%s2578_s4] sm:$0xff]  ;;  %v1721_v32 = vld [vmem:[%s2578_s4 + $0x30] sm:$0xff]  ;;  %v1722_v53 = vld [vmem:[%s2578_s4 + $0x38] sm:$0xff] }
 0x4b4   :  { %2012 = vmatmul.mubr.msk.f32.vlgmr.msra.gmra.mrb[12].mxu0 %vm151_vm2, %v862_v45  ;;  %2087 = vmatpush3.bf16.msra.mxu1 %v2084_v52  ;;  %v1716_v45 = vld [vmem:[%s2578_s4 + $0x8] sm:$0xff]  ;;  %v2108_v52 = vpack.c.bf16 %v1720_v51, %v1719_v50 }
 0x4b5   :  { %2089 = vmatprep.subr.bf16.mxu1 %v2088_v54 }
 0x4b8   :  { %2091 = vmatpush3.bf16.msra.mxu1 %v2088_v54  ;;  %v2112_v54 = vpack.c.bf16 %v1722_v53, %v1721_v32 }
 0x4b9   :  { %2093 = vmatprep.subr.bf16.mxu1 %v2092_v40 }
 0x56b   :  { %v939_v46 = vpop.f32.mrb[6].mxu0 }
 0x56c   :  { %v1983_v47 = vpop.f32.mrb[7].mxu0 }
 0x56d   :  { %v2100_v47 = vpack.c.bf16 %v1716_v45, %v1715_v44 }
 0x56f   :  { %v1015_v48 = vpop.f32.mrb[12].mxu1  ;;  %2101 = vmatprep.subr.bf16.mxu0 %v2100_v47 }
 0x570   :  { %v1988_v49 = vpop.f32.mrb[13].mxu1  ;;  %2103 = vmatpush3.bf16.msra.mxu0 %v2100_v47 }
 0x57a   :  { %v1091_v55 = vpop.f32.mrb[8].mxu0 }
 0x57b   :  { %1477 = vrot.lane.b32.xlu0 %v1091_v55, %s2227_s9  ;;  %v1993_v56 = vpop.f32.mrb[9].mxu0  ;;  %v1723_v55 = vld [vmem:[%s2578_s4 + $0x40] sm:$0xff] }
 0x57c   :  { %v1724_v56 = vld [vmem:[%s2578_s4 + $0x48] sm:$0xff] }
 0x57e   :  { %v1167_v57 = vpop.f32.mrb[14].mxu1 }
 0x57f   :  { %1479 = vrot.lane.b32.xlu1 %v1167_v57, %s2227_s9  ;;  %v1998_v58 = vpop.f32.mrb[15].mxu1  ;;  %v2116_v57 = vpack.c.bf16 %v1724_v56, %v1723_v55 }
 0x580   :  { %v1725_v58 = vld [vmem:[%s2578_s4 + $0x50] sm:$0xff] }
 0x582   :  { %v1319_v59 = vpop.f32.mrb[16].mxu1 }
 0x583   :  { %v1243_v60 = vpop.f32.mrb[10].mxu0  ;;  %1487 = vrot.lane.b32.xlu1 %v1319_v59, %s2228_s10  ;;  %v2008_v61 = vpop.f32.mrb[17].mxu1  ;;  %v1726_v59 = vld [vmem:[%s2578_s4 + $0x58] sm:$0xff] }
 0x584   :  { %1485 = vrot.lane.b32.xlu0 %v1243_v60, %s2228_s10  ;;  %v2003_v62 = vpop.f32.mrb[11].mxu0  ;;  %v2120_v60 = vpack.c.bf16 %v1726_v59, %v1725_v58  ;;  %v1727_v61 = vld [vmem:[%s2578_s4 + $0x60] sm:$0xff] }
 0x585   :  { %v1728_v62 = vld [vmem:[%s2578_s4 + $0x68] sm:$0xff] }
 0x586   :  { %v1471_v63 = vpop.f32.mrb[18].mxu1 }
 0x587   :  { %v1395_v2 = vpop.f32.mrb[12].mxu0  ;;  %1495 = vrot.lane.b32.xlu1 %v1471_v63, %s2229_s2  ;;  %v2018_v3 = vpop.f32.mrb[19].mxu1  ;;  %v2124_v63 = vpack.c.bf16 %v1728_v62, %v1727_v61 }
 0x588   :  { %1493 = vrot.lane.b32.xlu0 %v1395_v2, %s2229_s2  ;;  %v2013_v4 = vpop.f32.mrb[13].mxu0 }
 0x5ed   :  { %v1478_v6 = vpop.permute.xlu0 %1477 }
 0x5ee   :  { %v1499_v10 = vsel %vm151_vm2, %v939_v46, %v1478_v6  ;;  %v1717_v46 = vld [vmem:[%s2578_s4 + $0x10] sm:$0xff] }
 0x5f1   :  { %v1480_v5 = vpop.permute.xlu1 %1479 }
 0x5f2   :  { %v1500_v9 = vsel %vm151_vm2, %v1015_v48, %v1480_v5  ;;  %v1718_v48 = vld [vmem:[%s2578_s4 + $0x18] sm:$0xff] }
 0x5f3   :  { %v2104_v49 = vpack.c.bf16 %v1718_v48, %v1717_v46 }
 0x5f5   :  { %v1488_v7 = vpop.permute.xlu1 %1487  ;;  %2105 = vmatprep.subr.bf16.mxu0 %v2104_v49 }
 0x5f6   :  { %v1486_v8 = vpop.permute.xlu0 %1485  ;;  %v1503_v11 = vsel %vm1501_vm3, %v1500_v9, %v1488_v7  ;;  %2107 = vmatpush3.bf16.msra.mxu0 %v2104_v49 }
 0x5f7   :  { %v1502_v13 = vsel %vm1501_vm3, %v1499_v10, %v1486_v8  ;;  %2109 = vmatprep.subr.bf16.mxu0 %v2108_v52 }
 0x5f9   :  { %v1496_v12 = vpop.permute.xlu1 %1495 }
 0x5fa   :  { %v1506_v14 = vsel %vm1504_vm4, %v1503_v11, %v1496_v12  ;;  %v1494_v15 = vpop.permute.xlu0 %1493  ;;  %2111 = vmatpush3.bf16.msra.mxu0 %v2108_v52  ;;  %v1729_v12 = vld [vmem:[%s2578_s4 + $0x70] sm:$0xff] }
 0x5fb   :  { %v1505_v16 = vsel %vm1504_vm4, %v1502_v13, %v1494_v15  ;;  %2113 = vmatprep.subr.bf16.mxu0 %v2112_v54  ;;  %v1730_v13 = vld [vmem:[%s2578_s4 + $0x78] sm:$0xff]  ;;  %v1630_v15 = vsub.s32 2, %v2299_v31  ;;  %s2230_s4 = smov [#allocation2]  }
 0x5fc   :  { %2027 = vmatprep.mubr.msk.f32.mxu1 %vm31_vm0, %v1505_v16  ;;  %s1819_s23 = sshll.u32 %s2230_s4, 4  ;;  %s1820_s23 = int_to_ptr.vmem [resolvable:$true] %s1819_s23 }
 0x5fd   :  { %2028 = vmatmul.mubr.msk.f32.vlgmr.msra.gmra.mrb[20].mxu1 %vm31_vm0, %v1506_v14  ;;  %v2128_v14 = vpack.c.bf16 %v1730_v13, %v1729_v12  ;;  %v1631_v16 = vrot.slane %v2311_v34, %v1630_v15  ;;  %s2190_s24 = scalar_lea.vmem %s1820_s23, 256  ;;  %p2195_p1 = scmp.lt.s32.totalorder %s1820_s23, %s1820_s23 }
 0x5fe   :  { %2095 = vmatpush3.bf16.msra.mxu1 %v2092_v40  ;;  %2115 = vmatpush3.bf16.msra.mxu0 %v2112_v54  ;;  %p2191_p0 = scmp.ne.s32.totalorder %s1820_s23, %s2190_s24  ;;  %p2196_p2 = scmp.lt.s32.totalorder %s2190_s24, %s2190_s24 }
 0x5ff   :  { %2097 = vmatprep.subr.bf16.mxu1 %v2096_v43  ;;  %2117 = vmatprep.subr.bf16.mxu0 %v2116_v57 }
 0x600   :  { %p2197_p3 = por %p2196_p2, %p2195_p1 }
 0x602   :  { %2099 = vmatpush3.bf16.msra.mxu1 %v2096_v43  ;;  %2119 = vmatpush3.bf16.msra.mxu0 %v2116_v57  ;;  %p2198_p4 = pnand %p2197_p3, %p2191_p0 }
 0x603   :  { %2121 = vmatprep.subr.bf16.mxu0 %v2120_v60 }
 0x606   :  { %2123 = vmatpush3.bf16.msra.mxu0 %v2120_v60 }
 0x607   :  { %2125 = vmatprep.subr.bf16.mxu0 %v2124_v63 }
 0x60a   :  { %2127 = vmatpush3.bf16.msra.mxu0 %v2124_v63 }
 0x60b   :  { %2129 = vmatprep.subr.bf16.mxu0 %v2128_v14 }
 0x60e   :  { %2131 = vmatpush3.bf16.msra.mxu0 %v2128_v14 }
 0x6d0   :  { %v2029_v19 = vpop.f32.mrb[20].mxu1 }
 0x6d1   :  { %v1593_v20 = vadd.f32 %v2029_v19, %v1514_v18  ;;  %v1587_v21 = vpop.f32.mrb[21].mxu1 }
 0x6d2   :  { %v1588_v22 = vadd.f32 %v1587_v21, %v1514_v18 }
 0x6d3   :  { %v2473_v37 = vadd.f32 %v1593_v20, %v2275_v1 }
 0x6d4   :  { %v2476_v39 = vadd.f32 %v1588_v22, %v2270_v0 }
 0x6d5   :  { %v1601_v23 = vsel %vm31_vm0, %v2473_v37, 0.0 }
 0x6d6   :  { %1602 = vadd.xlane.f32.xlu1 %v1601_v23  ;;  %v1598_v24 = vsel %vm31_vm0, %v2476_v39, 0.0  ;;  %v1733_v23 = vsub.s32 3, %v2299_v31 }
 0x6d7   :  { %1599 = vadd.xlane.f32.xlu0 %v1598_v24 }
 0x6d8   :  { %v1734_v24 = vrot.slane %v2311_v34, %v1733_v23 }
 0x763   :  { %v1603_v25 = vpop.xlane.xlu1 %1602 }
 0x764   :  { %v1605_v26 = vmul.f32 0.03125, %v1603_v25  ;;  %v1600_v27 = vpop.xlane.xlu0 %1599 }
 0x765   :  { %v1604_v28 = vmul.f32 0.03125, %v1600_v27 }
 0x766   :  { %v2483_v29 = vsub.f32 %v2473_v37, %v1605_v26 }
 0x767   :  { %v1606_v1 = vsub.f32 %v2476_v39, %v1604_v28 }
 0x768   :  { %v1609_v33 = vmul.f32 %v2483_v29, %v2483_v29 }
 0x769   :  { %v1608_v30 = vmul.f32 %v1606_v1, %v1606_v1 }
 0x76a   :  { %v1613_v35 = vsel %vm31_vm0, %v1609_v33, 0.0 }
 0x76b   :  { %v1610_v0 = vsel %vm31_vm0, %v1608_v30, 0.0 }
 0x76c   :  { %1611 = vadd.xlane.f32.xlu0 %v1610_v0 }
 0x770   :  { %1614 = vadd.xlane.f32.xlu0 %v1613_v35 }
 0x7f9   :  { %v1612_v2 = vpop.xlane.xlu0 %1611 }
 0x7fa   :  { %v1616_v3 = vmul.f32 0.03125, %v1612_v2 }
 0x7fc   :  { %v1618_v4 = vadd.f32 1e-05, %v1616_v3 }
 0x7fd   :  { %v1615_v5 = vpop.xlane.xlu0 %1614 }
 0x7fe   :  { %2186 = vrsqrt.f32 %v1618_v4  ;;  %v1617_v6 = vmul.f32 0.03125, %v1615_v5 }
 0x800   :  { %v1619_v7 = vadd.f32 1e-05, %v1617_v6 }
 0x802   :  { %2188 = vrsqrt.f32 %v1619_v7 }
 0x808   :  { %v2187_v8 = vpop.eup %2186 }
 0x809   :  { %v1622_v9 = vmul.f32 %v2187_v8, %v1606_v1 }
 0x80b   :  { %2038 = vmatprep.mubr.msk.f32.mxu1 %vm31_vm0, %v1622_v9 }
 0x80c   :  { %v2189_v10 = vpop.eup %2188 }
 0x80d   :  { %v1623_v11 = vmul.f32 %v2189_v10, %v2483_v29 }
 0x80f   :  { %2039 = vmatmul.mubr.msk.f32.vlgmr.msra.gmra.mrb[22].mxu1 %vm31_vm0, %v1623_v11 }
 0x8e2   :  { %v2040_v17 = vpop.f32.mrb[22].mxu1 }
 0x8e3   :  { %v1710_v18 = vadd.f32 %v2040_v17, %v1631_v16  ;;  %v1704_v19 = vpop.f32.mrb[23].mxu1 }
 0x8e4   :  { %v1705_v20 = vadd.f32 %v1704_v19, %v1631_v16 }
 0x8e5   :  { %v1714_v22 = vmax.f32 %v1710_v18, 0.0 }
 0x8e6   :  { %v1713_v21 = vmax.f32 %v1705_v20, 0.0 }
 0x8e8   :  { %2073 = vmatprep.mubr.f32.mxu0 %v1713_v21 }
 0x8e9   :  { %2074 = vmatmul.mubr.f32.vlgmr.msra.gmra.mrb[14].mxu0 %v1714_v22 }
 0x9bc   :  { %v2075_v25 = vpop.f32.mrb[14].mxu0 }
 0x9bd   :  { %v1807_v26 = vadd.f32 %v2075_v25, %v1734_v24  ;;  %v1801_v27 = vpop.f32.mrb[15].mxu0 }
 0x9be   :  { %v1802_v28 = vadd.f32 %v1801_v27, %v1734_v24 }
 0x9bf   :  { %v1811_v29 = vadd.f32 %v1807_v26, %v2473_v37 }
 0x9c0   :  { %v1810_v1 = vadd.f32 %v1802_v28, %v2476_v39 }
 0x9c1   :  { %1813 = vst.msk [vmem:[#allocation2 + $0x8] sm:$0xff] %vm31_vm0, %v1811_v29 }
 0x9c2   :  { %1812 = vst.msk [vmem:[#allocation2] sm:$0xff] %vm31_vm0, %v1810_v1 }
 0x9c3   :  { %2201 = shalt.err (!%p2198_p4)
}
 0x9c4   :  { %s2202_s3 = scalar_lea.hbm %s2580_s6, 256 }
 0x9c5   :  { %p2203_p5 = scmp.ne.s32.totalorder %s2580_s6, %s2202_s3  ;;  %p2206_p6 = scmp.lt.u32.totalorder %s2202_s3, %s2580_s6 }
 0x9c7   :  { %p2208_p7 = pnand %p2206_p6, %p2203_p5 }
 0x9c9   :  { %2211 = shalt.err (!%p2208_p7)
}
 0x9ca   :  { %s2231_s29 = smov 128  }
 0x9cb   :  { %1825 = dma.vmem_to_hbm [thread:$0]  %s1820_s23, 256, %s2580_s6, [#allocation3], %s2231_s29, %s2231_s29, %s2227_s9  }
 0x9cc   :  { %2212 = dma.done.wait [#allocation3], 256  }
 0x9cd   :  { %2213 = vsyncadd [#allocation3], 4294967040 }
 0x9ce   :  { %1829 = vsyncpa [#allocation3], 1 }

</bundles_post_ra>
